<compile_context>
chip_gen: v7x
topology: tpu7x:2x2x1
jax: 0.10.0
libtpu: 0.0.40
codegen_flags: <defaults>
</compile_context>

<pallas_src>
import functools
import math

import numpy as np
import jax
import jax.numpy as jnp
from jax.experimental import pallas as pl
from jax.experimental.pallas import tpu as pltpu


# -----------------------------------------------------------------------------
# DWT analysis matrices -- faithful port of DWT_2D.get_matrix().
# TODO(synk): pywt.Wavelet(wavename) lookup replaced by hardcoded 'haar'
# reconstruction filters (rec_lo / rec_hi) so the script is self-contained.
# -----------------------------------------------------------------------------
_S = 1.0 / math.sqrt(2.0)
HAAR_REC_LO = [_S, _S]
HAAR_REC_HI = [_S, -_S]


def build_dwt_matrices(height, width, band_low=HAAR_REC_LO, band_high=HAAR_REC_HI):
    band_length = len(band_low)
    assert band_length % 2 == 0
    half = band_length // 2
    L1 = max(height, width)
    L = L1 // 2
    matrix_h = np.zeros((L, L1 + band_length - 2), dtype=np.float64)
    matrix_g = np.zeros((L1 - L, L1 + band_length - 2), dtype=np.float64)
    end = None if half == 1 else (-half + 1)

    index = 0
    for i in range(L):
        for j in range(band_length):
            matrix_h[i, index + j] = band_low[j]
        index += 2
    matrix_h_0 = matrix_h[0:height // 2, 0:height + band_length - 2]
    matrix_h_1 = matrix_h[0:width // 2, 0:width + band_length - 2]

    index = 0
    for i in range(L1 - L):
        for j in range(band_length):
            matrix_g[i, index + j] = band_high[j]
        index += 2
    matrix_g_0 = matrix_g[0:height - height // 2, 0:height + band_length - 2]
    matrix_g_1 = matrix_g[0:width - width // 2, 0:width + band_length - 2]

    matrix_h_0 = matrix_h_0[:, half - 1:end]
    matrix_h_1 = np.transpose(matrix_h_1[:, half - 1:end])
    matrix_g_0 = matrix_g_0[:, half - 1:end]
    matrix_g_1 = np.transpose(matrix_g_1[:, half - 1:end])
    return (matrix_h_0.astype(np.float32), matrix_h_1.astype(np.float32),
            matrix_g_0.astype(np.float32), matrix_g_1.astype(np.float32))


def _extract_2tap_column_filter(ml1, mh1, w):
    """Extract the 2-tap column filters and verify the expected Haar structure."""
    # TODO(synk): longer (non 2-tap) wavelets would need a per-channel matrix column
    # transform instead of the roll-based fast path below.
    w2 = w // 2
    ml1_np = np.asarray(ml1, np.float64)
    mh1_np = np.asarray(mh1, np.float64)
    assert ml1_np.shape == (w, w2) and mh1_np.shape == (w, w2)
    lo = (float(ml1_np[0, 0]), float(ml1_np[1, 0]))
    hi = (float(mh1_np[0, 0]), float(mh1_np[1, 0]))
    cols = np.arange(w2)
    expect_l = np.zeros((w, w2)); expect_h = np.zeros((w, w2))
    expect_l[2 * cols, cols] = lo[0]; expect_l[2 * cols + 1, cols] = lo[1]
    expect_h[2 * cols, cols] = hi[0]; expect_h[2 * cols + 1, cols] = hi[1]
    if not (np.allclose(expect_l, ml1_np) and np.allclose(expect_h, mh1_np)):
        raise NotImplementedError("fast column path assumes a 2-tap (Haar-like) wavelet")
    return lo, hi


def _build_selectors(s_per, c, h, w, tb):
    """Constant selector matrices (built once in numpy, DMA'd once per call)."""
    h2, w2 = h // 2, w // 2
    ngrp = 2 * s_per * c
    srow = np.zeros((2, h), np.float32)
    srow[0, :h2] = 1.0
    srow[1, h2:] = 1.0
    rowsel = np.zeros((h, 2), np.float32)
    rowsel[:h2, 0] = 1.0
    rowsel[h2:, 1] = 1.0
    csel = np.zeros((tb, ngrp), np.float32)        # column -> (sample, col-band, channel) mean
    cselT = np.zeros((ngrp, tb), np.float32)       # (sample, col-band, channel) -> columns
    for si in range(s_per):
        for ci in range(c):
            base = si * c * w + ci * w
            for cb in range(2):                    # 0 = low (even cols), 1 = high (odd cols)
                col = (si * 2 + cb) * c + ci
                idx = base + np.arange(0, w, 2) + cb
                csel[idx, col] = 1.0 / float(h2 * w2)
                cselT[col, idx] = 1.0
    emask = np.zeros((1, tb), np.float32)
    emask[0, 0::2] = 1.0
    return srow, rowsel, csel, cselT, emask


# -----------------------------------------------------------------------------
# Pallas kernel: fused row-transform matmul + VPU Haar column transform +
# batched ChannelAttention gating. One lane-dense (H, Tb) slab per grid step.
# -----------------------------------------------------------------------------
def _dwt_ca_kernel(x_ref, m0_ref, srow_ref, csel_ref, cselT_ref, rowsel_ref,
                   emask_ref, w0_ref, w1_ref, w2_ref, out_ref,
                   *, lo_a, lo_b, hi_a, hi_b, lanes):
    x = x_ref[0]                                                         # (H, Tb) bf16

    # --- row (height) transform: one MXU matmul, f32 accumulate ---------------
    y = jnp.dot(m0_ref[...], x, preferred_element_type=jnp.float32)     # (H, Tb) f32

    # --- column (width) transform: 2-tap Haar on VPU/XLU (kron-free) ----------
    # Rotate-convention-agnostic neighbour fetch: a tiny probe determines the
    # hardware rotate direction so the pair ordering never silently flips.
    # Cost: one (8,128) roll + two VPU selects per step -- negligible.
    lane_idx = jax.lax.broadcasted_iota(jnp.int32, (8, 128), 1)
    probe = (lane_idx == 0).astype(jnp.float32)
    sel = pltpu.roll(probe, shift=1, axis=1)[0:1, 1:2]                   # 1.0 iff np.roll convention
    r_fwd = pltpu.roll(y, shift=1, axis=1)
    r_bwd = pltpu.roll(y, shift=lanes - 1, axis=1)
    y_next = sel * r_bwd + (1.0 - sel) * r_fwd                           # y[:, t+1]
    y_prev = sel * r_fwd + (1.0 - sel) * r_bwd                           # y[:, t-1]

    em = emask_ref[...]                                                  # (1, Tb): 1 at even cols
    z_low = lo_a * y + lo_b * y_next           # valid at even columns (low-pass pair result)
    z_high = hi_a * y_prev + hi_b * y          # valid at odd columns  (high-pass pair result)
    z = em * z_low + (1.0 - em) * z_high       # interleaved: even = low cols, odd = high cols

    # --- per-(sample, channel, sub-band) means via selector matmuls -----------
    rs = jnp.dot(srow_ref[...], z, preferred_element_type=jnp.float32)      # (2, Tb)
    m = jnp.dot(rs, csel_ref[...], preferred_element_type=jnp.float32)      # (2, 2*S*C)

    # --- ChannelAttention MLP, all (row-band, sample, col-band) groups at once
    a = jnp.dot(m, w0_ref[...], preferred_element_type=jnp.float32)
    a = jnp.maximum(jnp.dot(a, w1_ref[...], preferred_element_type=jnp.float32), 0.0)
    a = jnp.dot(a, w2_ref[...], preferred_element_type=jnp.float32)
    scale = jax.nn.sigmoid(a)                                                # (2, 2*S*C)

    # --- expand scale to (H, Tb) with two tiny matmuls; one dense block store --
    scale_rows = jnp.dot(scale, cselT_ref[...],
                         preferred_element_type=jnp.float32)                 # (2, Tb)
    scale_map = jnp.dot(rowsel_ref[...], scale_rows,
                        preferred_element_type=jnp.float32)                  # (H, Tb)
    out_ref[0] = z * scale_map


def dwt2d_forward(x, ml0, ml1, mh0, mh1, w_fc, w_fc1, w_fc2, *, target_lanes=512):
    n, c, h, w = x.shape
    assert h % 2 == 0 and w % 2 == 0
    h2, w2 = h // 2, w // 2
    f32 = jnp.float32
    hidden = w_fc.shape[0]     # 60
    mid = w_fc1.shape[0]       # 60 // 15 = 4

    (lo_a, lo_b), (hi_a, hi_b) = _extract_2tap_column_filter(ml1, mh1, w)

    # Samples per block: grow the lane width toward ~target_lanes (S must divide N).
    s_per = 1
    for s in range(1, n + 1):
        if n % s == 0 and s * c * w <= target_lanes:
            s_per = s
    g = n // s_per
    d = s_per * c * w
    tb = ((d + 127) // 128) * 128           # pad lanes to a multiple of 128 (dense stores)
    ngrp = 2 * s_per * c

    # Fused row-transform matrix (bf16 for the MXU; f32 accumulation in-kernel).
    m0 = jnp.concatenate([ml0, mh0], axis=0).astype(jnp.bfloat16)            # (H, H)

    srow, rowsel, csel, cselT, emask = map(
        jnp.asarray, _build_selectors(s_per, c, h, w, tb))

    # 1x1-conv weights transposed, duplicated block-diagonally over the 2*S groups
    # so the tiny attention MLP runs as three small batched matmuls.
    eye_g = jnp.eye(2 * s_per, dtype=f32)
    w0_bd = jnp.kron(eye_g, jnp.transpose(w_fc).astype(f32))                 # (2SC, 2S*60)
    w1_bd = jnp.kron(eye_g, jnp.transpose(w_fc1).astype(f32))                # (2S*60, 2S*4)
    w2_bd = jnp.kron(eye_g, jnp.transpose(w_fc2).astype(f32))                # (2S*4, 2SC)

    # TODO(synk): callers that can supply (and consume) the lane-flattened layout
    # directly would avoid these two full-tensor HBM transposes in the wrapper.
    x_g = x.reshape(g, s_per, c, h, w)
    x_g = jnp.transpose(x_g, (0, 3, 1, 2, 4)).reshape(g, h, d)
    if tb != d:
        x_g = jnp.pad(x_g, ((0, 0), (0, 0), (0, tb - d)))
    x_g = x_g.astype(jnp.bfloat16)                                           # (G, H, Tb)

    flops_step = (2 * h * h * tb                       # row transform (MXU)
                  + 10 * h * tb                        # Haar column transform + gating (VPU)
                  + 2 * 2 * h * tb                     # row-half sums
                  + 2 * 2 * tb * ngrp                  # quadrant means
                  + 2 * 2 * ngrp * 2 * s_per * hidden
                  + 2 * 2 * 2 * s_per * hidden * 2 * s_per * mid
                  + 2 * 2 * 2 * s_per * mid * ngrp
                  + 2 * 2 * ngrp * tb                  # scale -> columns
                  + 2 * h * 2 * tb)                    # scale -> rows
    const_bytes = 2 * h * h + 4 * (2 * h + 2 * h + tb + 2 * tb * ngrp
                                   + ngrp * 2 * s_per * hidden
                                   + 2 * s_per * hidden * 2 * s_per * mid
                                   + 2 * s_per * mid * ngrp)
    cost = pl.CostEstimate(flops=g * flops_step,
                           transcendentals=g * 2 * ngrp,
                           bytes_accessed=g * h * tb * (2 + 4) + const_bytes)

    grid_spec = pltpu.PrefetchScalarGridSpec(
        num_scalar_prefetch=0,
        grid=(g,),
        in_specs=[
            pl.BlockSpec((1, h, tb), lambda i: (i, 0, 0)),              # x slab (bf16)
            pl.BlockSpec((h, h), lambda i: (0, 0)),                     # M0 (bf16)
            pl.BlockSpec((2, h), lambda i: (0, 0)),                     # row-half sums
            pl.BlockSpec((tb, ngrp), lambda i: (0, 0)),                 # mean column selector
            pl.BlockSpec((ngrp, tb), lambda i: (0, 0)),                 # scale column expander
            pl.BlockSpec((h, 2), lambda i: (0, 0)),                     # row-band selector
            pl.BlockSpec((1, tb), lambda i: (0, 0)),                    # even-lane mask
            pl.BlockSpec((ngrp, 2 * s_per * hidden), lambda i: (0, 0)),             # fc
            pl.BlockSpec((2 * s_per * hidden, 2 * s_per * mid), lambda i: (0, 0)),  # fc1
            pl.BlockSpec((2 * s_per * mid, ngrp), lambda i: (0, 0)),                # fc2
        ],
        out_specs=pl.BlockSpec((1, h, tb), lambda i: (i, 0, 0)),
    )
    out_slab = pl.pallas_call(
        functools.partial(_dwt_ca_kernel, lo_a=lo_a, lo_b=lo_b,
                          hi_a=hi_a, hi_b=hi_b, lanes=tb),
        out_shape=jax.ShapeDtypeStruct((g, h, tb), jnp.float32),
        grid_spec=grid_spec,
        compiler_params=pltpu.CompilerParams(dimension_semantics=("parallel",)),
        cost_estimate=cost,
    )(x_g, m0, srow, csel, cselT, rowsel, emask, w0_bd, w1_bd, w2_bd)

    # Cheap XLA layout plumbing: slab -> four (N, C, H/2, W/2) sub-bands.
    out = out_slab[:, :, :d].reshape(g, h, s_per, c, w)
    out = jnp.transpose(out, (0, 2, 3, 1, 4)).reshape(n, c, h, w)
    ll = out[:, :, :h2, 0::2]
    lh = out[:, :, :h2, 1::2]
    hl = out[:, :, h2:, 0::2]
    hh = out[:, :, h2:, 1::2]
    return ll, lh, hl, hh


# -----------------------------------------------------------------------------
# Pure numpy (float64) reference of the PyTorch forward for verification.
# (fc before avg_pool in the module == avg_pool before fc: 1x1 conv, no bias.)
# -----------------------------------------------------------------------------
def reference_forward(x, ml0, ml1, mh0, mh1, w_fc, w_fc1, w_fc2):
    x = np.asarray(x, np.float64)
    ml0, ml1, mh0, mh1 = (np.asarray(a, np.float64) for a in (ml0, ml1, mh0, mh1))
    w_fc, w_fc1, w_fc2 = (np.asarray(a, np.float64) for a in (w_fc, w_fc1, w_fc2))
    lo = np.matmul(ml0, x)                 # (N, C, H/2, W)
    hi = np.matmul(mh0, x)
    subbands = (np.matmul(lo, ml1), np.matmul(lo, mh1),
                np.matmul(hi, ml1), np.matmul(hi, mh1))
    outs = []
    for sub in subbands:
        m = sub.mean(axis=(2, 3))                      # (N, C)
        a0 = m @ w_fc.T                                # (N, 60)
        a1 = np.maximum(a0 @ w_fc1.T, 0.0)             # (N, 4)
        a2 = a1 @ w_fc2.T                              # (N, C)
        s = 1.0 / (1.0 + np.exp(-a2))                  # sigmoid
        outs.append(sub * s[:, :, None, None])
    return outs


def _run_case(n, c, h, w, key):
    k_x, k0, k1, k2 = jax.random.split(key, 4)
    x = jax.random.normal(k_x, (n, c, h, w), dtype=jnp.float32)
    ml0, ml1, mh0, mh1 = (jnp.asarray(m) for m in build_dwt_matrices(h, w))
    hidden, ratio = 60, 15
    mid = hidden // ratio                 # 4
    # 1x1 Conv2d (bias=False) weights squeezed to (out, in); deterministic init.
    w_fc = jax.random.normal(k0, (hidden, c), dtype=jnp.float32) / np.sqrt(c)
    w_fc1 = jax.random.normal(k1, (mid, hidden), dtype=jnp.float32) / np.sqrt(hidden)
    w_fc2 = jax.random.normal(k2, (c, mid), dtype=jnp.float32) / np.sqrt(mid)

    outs = dwt2d_forward(x, ml0, ml1, mh0, mh1, w_fc, w_fc1, w_fc2)
    outs = jax.block_until_ready(outs)

    refs = reference_forward(x, ml0, ml1, mh0, mh1, w_fc, w_fc1, w_fc2)
    for got, want in zip(outs, refs):
        assert got.shape == (n, c, h // 2, w // 2)
        np.testing.assert_allclose(np.asarray(got), want, rtol=2e-2, atol=2e-2)


if __name__ == "__main__":
    key = jax.random.PRNGKey(0)
    key_a, key_b = jax.random.split(key)
    # in_planes=3 path: two samples batched per block, 96 -> 128 padded lanes.
    _run_case(2, 3, 16, 16, key_a)
    # in_planes=12, non-square: one sample per block, 768 dense lanes, grid of 2.
    _run_case(2, 12, 32, 64, key_b)
    print("KERNEL_OK")
</pallas_src>

<mosaic_0001>
module attributes {stable_mosaic.version = 11 : i64} {
  func.func @_dwt_ca_kernel(%arg0: i32, %arg1: memref<1x16x128xbf16, #tpu.memory_space<vmem>>, %arg2: memref<16x16xbf16, #tpu.memory_space<vmem>>, %arg3: memref<2x16xf32, #tpu.memory_space<vmem>>, %arg4: memref<128x12xf32, #tpu.memory_space<vmem>>, %arg5: memref<12x128xf32, #tpu.memory_space<vmem>>, %arg6: memref<16x2xf32, #tpu.memory_space<vmem>>, %arg7: memref<1x128xf32, #tpu.memory_space<vmem>>, %arg8: memref<12x240xf32, #tpu.memory_space<vmem>>, %arg9: memref<240x16xf32, #tpu.memory_space<vmem>>, %arg10: memref<16x12xf32, #tpu.memory_space<vmem>>, %arg11: memref<1x16x128xf32, #tpu.memory_space<vmem>>) attributes {dimension_semantics = [#tpu.dimension_semantics<parallel>], iteration_bounds = array<i64: 1>, scalar_prefetch = 0 : i64, scratch_operands = 0 : i64, tpu.core_type = #tpu.core_type<tc>, window_params = [{transform_indices = @transform_0, window_bounds = array<i64: 1, 16, 128>}, {pipeline_mode = #tpu.pipeline_mode<synchronous>, transform_indices = @transform_1, window_bounds = array<i64: 16, 16>}, {pipeline_mode = #tpu.pipeline_mode<synchronous>, transform_indices = @transform_2, window_bounds = array<i64: 2, 16>}, {pipeline_mode = #tpu.pipeline_mode<synchronous>, transform_indices = @transform_3, window_bounds = array<i64: 128, 12>}, {pipeline_mode = #tpu.pipeline_mode<synchronous>, transform_indices = @transform_4, window_bounds = array<i64: 12, 128>}, {pipeline_mode = #tpu.pipeline_mode<synchronous>, transform_indices = @transform_5, window_bounds = array<i64: 16, 2>}, {pipeline_mode = #tpu.pipeline_mode<synchronous>, transform_indices = @transform_6, window_bounds = array<i64: 1, 128>}, {pipeline_mode = #tpu.pipeline_mode<synchronous>, transform_indices = @transform_7, window_bounds = array<i64: 12, 240>}, {pipeline_mode = #tpu.pipeline_mode<synchronous>, transform_indices = @transform_8, window_bounds = array<i64: 240, 16>}, {pipeline_mode = #tpu.pipeline_mode<synchronous>, transform_indices = @transform_9, window_bounds = array<i64: 16, 12>}, {transform_indices = @transform_10, window_bounds = array<i64: 1, 16, 128>}]} {
    %c0 = arith.constant 0 : index
    %c0_0 = arith.constant 0 : index
    %c0_1 = arith.constant 0 : index
    %0 = vector.load %arg1[%c0, %c0_0, %c0_1] : memref<1x16x128xbf16, #tpu.memory_space<vmem>>, vector<1x16x128xbf16>
    %1 = vector.shape_cast %0 : vector<1x16x128xbf16> to vector<16x128xbf16>
    %c0_2 = arith.constant 0 : index
    %c0_3 = arith.constant 0 : index
    %2 = vector.load %arg2[%c0_2, %c0_3] : memref<16x16xbf16, #tpu.memory_space<vmem>>, vector<16x16xbf16>
    %cst = arith.constant dense<0.000000e+00> : vector<16x128xf32>
    %3 = tpu.matmul %2, %1, %cst {dimension_numbers = #tpu.dot_dimension_numbers<[1], [0], [0], [1], [0, 0, 1, 1], [], []>} : vector<16x16xbf16>, vector<16x128xbf16>, vector<16x128xf32> -> vector<16x128xf32>
    %4 = tpu.iota {dimensions = array<i32: 1>} : vector<8x128xi32>
    %c0_i32 = arith.constant 0 : i32
    %5 = vector.broadcast %c0_i32 : i32 to vector<8x128xi32>
    %6 = arith.cmpi eq, %4, %5 : vector<8x128xi32>
    %7 = arith.extui %6 : vector<8x128xi1> to vector<8x128xi32>
    %8 = arith.sitofp %7 : vector<8x128xi32> to vector<8x128xf32>
    %c1_i32 = arith.constant 1 : i32
    %9 = tpu.dynamic_rotate %8 by %c1_i32 dim 1 : vector<8x128xf32>, i32 -> vector<8x128xf32>
    %10 = vector.extract_strided_slice %9 {offsets = [0, 1], sizes = [1, 1], strides = [1, 1]} : vector<8x128xf32> to vector<1x1xf32>
    %c1_i32_4 = arith.constant 1 : i32
    %11 = tpu.dynamic_rotate %3 by %c1_i32_4 dim 1 : vector<16x128xf32>, i32 -> vector<16x128xf32>
    %c127_i32 = arith.constant 127 : i32
    %12 = tpu.dynamic_rotate %3 by %c127_i32 dim 1 : vector<16x128xf32>, i32 -> vector<16x128xf32>
    %13 = vector.broadcast %10 : vector<1x1xf32> to vector<16x128xf32>
    %14 = arith.mulf %13, %12 : vector<16x128xf32>
    %cst_5 = arith.constant 1.000000e+00 : f32
    %15 = vector.broadcast %cst_5 : f32 to vector<1x1xf32>
    %16 = arith.subf %15, %10 : vector<1x1xf32>
    %17 = vector.broadcast %16 : vector<1x1xf32> to vector<16x128xf32>
    %18 = arith.mulf %17, %11 : vector<16x128xf32>
    %19 = arith.addf %14, %18 : vector<16x128xf32>
    %20 = vector.broadcast %10 : vector<1x1xf32> to vector<16x128xf32>
    %21 = arith.mulf %20, %11 : vector<16x128xf32>
    %cst_6 = arith.constant 1.000000e+00 : f32
    %22 = vector.broadcast %cst_6 : f32 to vector<1x1xf32>
    %23 = arith.subf %22, %10 : vector<1x1xf32>
    %24 = vector.broadcast %23 : vector<1x1xf32> to vector<16x128xf32>
    %25 = arith.mulf %24, %12 : vector<16x128xf32>
    %26 = arith.addf %21, %25 : vector<16x128xf32>
    %c0_7 = arith.constant 0 : index
    %c0_8 = arith.constant 0 : index
    %27 = vector.load %arg7[%c0_7, %c0_8] : memref<1x128xf32, #tpu.memory_space<vmem>>, vector<1x128xf32>
    %cst_9 = arith.constant 0.707106769 : f32
    %28 = vector.broadcast %cst_9 : f32 to vector<16x128xf32>
    %29 = arith.mulf %28, %3 : vector<16x128xf32>
    %cst_10 = arith.constant 0.707106769 : f32
    %30 = vector.broadcast %cst_10 : f32 to vector<16x128xf32>
    %31 = arith.mulf %30, %19 : vector<16x128xf32>
    %32 = arith.addf %29, %31 : vector<16x128xf32>
    %cst_11 = arith.constant 0.707106769 : f32
    %33 = vector.broadcast %cst_11 : f32 to vector<16x128xf32>
    %34 = arith.mulf %33, %26 : vector<16x128xf32>
    %cst_12 = arith.constant -0.707106769 : f32
    %35 = vector.broadcast %cst_12 : f32 to vector<16x128xf32>
    %36 = arith.mulf %35, %3 : vector<16x128xf32>
    %37 = arith.addf %34, %36 : vector<16x128xf32>
    %38 = vector.broadcast %27 : vector<1x128xf32> to vector<16x128xf32>
    %39 = arith.mulf %38, %32 : vector<16x128xf32>
    %cst_13 = arith.constant 1.000000e+00 : f32
    %40 = vector.broadcast %cst_13 : f32 to vector<1x128xf32>
    %41 = arith.subf %40, %27 : vector<1x128xf32>
    %42 = vector.broadcast %41 : vector<1x128xf32> to vector<16x128xf32>
    %43 = arith.mulf %42, %37 : vector<16x128xf32>
    %44 = arith.addf %39, %43 : vector<16x128xf32>
    %c0_14 = arith.constant 0 : index
    %c0_15 = arith.constant 0 : index
    %45 = vector.load %arg3[%c0_14, %c0_15] : memref<2x16xf32, #tpu.memory_space<vmem>>, vector<2x16xf32>
    %cst_16 = arith.constant dense<0.000000e+00> : vector<2x128xf32>
    %46 = tpu.matmul %45, %44, %cst_16 {dimension_numbers = #tpu.dot_dimension_numbers<[1], [0], [0], [1], [0, 0, 1, 1], [], []>} : vector<2x16xf32>, vector<16x128xf32>, vector<2x128xf32> -> vector<2x128xf32>
    %c0_17 = arith.constant 0 : index
    %c0_18 = arith.constant 0 : index
    %47 = vector.load %arg4[%c0_17, %c0_18] : memref<128x12xf32, #tpu.memory_space<vmem>>, vector<128x12xf32>
    %cst_19 = arith.constant dense<0.000000e+00> : vector<2x12xf32>
    %48 = tpu.matmul %46, %47, %cst_19 {dimension_numbers = #tpu.dot_dimension_numbers<[1], [0], [0], [1], [0, 0, 1, 1], [], []>} : vector<2x128xf32>, vector<128x12xf32>, vector<2x12xf32> -> vector<2x12xf32>
    %c0_20 = arith.constant 0 : index
    %c0_21 = arith.constant 0 : index
    %49 = vector.load %arg8[%c0_20, %c0_21] : memref<12x240xf32, #tpu.memory_space<vmem>>, vector<12x240xf32>
    %cst_22 = arith.constant dense<0.000000e+00> : vector<2x240xf32>
    %50 = tpu.matmul %48, %49, %cst_22 {dimension_numbers = #tpu.dot_dimension_numbers<[1], [0], [0], [1], [0, 0, 1, 1], [], []>} : vector<2x12xf32>, vector<12x240xf32>, vector<2x240xf32> -> vector<2x240xf32>
    %c0_23 = arith.constant 0 : index
    %c0_24 = arith.constant 0 : index
    %51 = vector.load %arg9[%c0_23, %c0_24] : memref<240x16xf32, #tpu.memory_space<vmem>>, vector<240x16xf32>
    %cst_25 = arith.constant dense<0.000000e+00> : vector<2x16xf32>
    %52 = tpu.matmul %50, %51, %cst_25 {dimension_numbers = #tpu.dot_dimension_numbers<[1], [0], [0], [1], [0, 0, 1, 1], [], []>} : vector<2x240xf32>, vector<240x16xf32>, vector<2x16xf32> -> vector<2x16xf32>
    %cst_26 = arith.constant 0.000000e+00 : f32
    %53 = vector.broadcast %cst_26 : f32 to vector<2x16xf32>
    %54 = arith.maximumf %52, %53 : vector<2x16xf32>
    %c0_27 = arith.constant 0 : index
    %c0_28 = arith.constant 0 : index
    %55 = vector.load %arg10[%c0_27, %c0_28] : memref<16x12xf32, #tpu.memory_space<vmem>>, vector<16x12xf32>
    %cst_29 = arith.constant dense<0.000000e+00> : vector<2x12xf32>
    %56 = tpu.matmul %54, %55, %cst_29 {dimension_numbers = #tpu.dot_dimension_numbers<[1], [0], [0], [1], [0, 0, 1, 1], [], []>} : vector<2x16xf32>, vector<16x12xf32>, vector<2x12xf32> -> vector<2x12xf32>
    %57 = arith.negf %56 : vector<2x12xf32>
    %58 = math.exp %57 : vector<2x12xf32>
    %cst_30 = arith.constant 1.000000e+00 : f32
    %59 = vector.broadcast %cst_30 : f32 to vector<2x12xf32>
    %60 = arith.addf %59, %58 : vector<2x12xf32>
    %61 = arith.divf %59, %60 : vector<2x12xf32>
    %c0_31 = arith.constant 0 : index
    %c0_32 = arith.constant 0 : index
    %62 = vector.load %arg5[%c0_31, %c0_32] : memref<12x128xf32, #tpu.memory_space<vmem>>, vector<12x128xf32>
    %cst_33 = arith.constant dense<0.000000e+00> : vector<2x128xf32>
    %63 = tpu.matmul %61, %62, %cst_33 {dimension_numbers = #tpu.dot_dimension_numbers<[1], [0], [0], [1], [0, 0, 1, 1], [], []>} : vector<2x12xf32>, vector<12x128xf32>, vector<2x128xf32> -> vector<2x128xf32>
    %c0_34 = arith.constant 0 : index
    %c0_35 = arith.constant 0 : index
    %64 = vector.load %arg6[%c0_34, %c0_35] : memref<16x2xf32, #tpu.memory_space<vmem>>, vector<16x2xf32>
    %cst_36 = arith.constant dense<0.000000e+00> : vector<16x128xf32>
    %65 = tpu.matmul %64, %63, %cst_36 {dimension_numbers = #tpu.dot_dimension_numbers<[1], [0], [0], [1], [0, 0, 1, 1], [], []>} : vector<16x2xf32>, vector<2x128xf32>, vector<16x128xf32> -> vector<16x128xf32>
    %66 = arith.mulf %44, %65 : vector<16x128xf32>
    %c0_37 = arith.constant 0 : index
    %c0_38 = arith.constant 0 : index
    %c0_39 = arith.constant 0 : index
    %67 = vector.load %arg11[%c0_37, %c0_38, %c0_39] : memref<1x16x128xf32, #tpu.memory_space<vmem>>, vector<1x16x128xf32>
    %68 = vector.shape_cast %67 : vector<1x16x128xf32> to vector<16x128xf32>
    %69 = vector.shape_cast %66 : vector<16x128xf32> to vector<1x16x128xf32>
    tpu.vector_store %arg11[%c0_37, %c0_38, %c0_39], %69 {strides = array<i32>} : memref<1x16x128xf32, #tpu.memory_space<vmem>>, vector<1x16x128xf32>,
    return
  }
  func.func @transform_0(%arg0: i32) -> (i32, i32, i32) {
    %c0_i32 = arith.constant 0 : i32
    %c0_i32_0 = arith.constant 0 : i32
    %c0_i32_1 = arith.constant 0 : i32
    return %arg0, %c0_i32, %c0_i32_0 : i32, i32, i32
  }
  func.func @transform_1(%arg0: i32) -> (i32, i32) {
    %c0_i32 = arith.constant 0 : i32
    %c0_i32_0 = arith.constant 0 : i32
    %c0_i32_1 = arith.constant 0 : i32
    return %c0_i32, %c0_i32_0 : i32, i32
  }
  func.func @transform_2(%arg0: i32) -> (i32, i32) {
    %c0_i32 = arith.constant 0 : i32
    %c0_i32_0 = arith.constant 0 : i32
    %c0_i32_1 = arith.constant 0 : i32
    return %c0_i32, %c0_i32_0 : i32, i32
  }
  func.func @transform_3(%arg0: i32) -> (i32, i32) {
    %c0_i32 = arith.constant 0 : i32
    %c0_i32_0 = arith.constant 0 : i32
    %c0_i32_1 = arith.constant 0 : i32
    return %c0_i32, %c0_i32_0 : i32, i32
  }
  func.func @transform_4(%arg0: i32) -> (i32, i32) {
    %c0_i32 = arith.constant 0 : i32
    %c0_i32_0 = arith.constant 0 : i32
    %c0_i32_1 = arith.constant 0 : i32
    return %c0_i32, %c0_i32_0 : i32, i32
  }
  func.func @transform_5(%arg0: i32) -> (i32, i32) {
    %c0_i32 = arith.constant 0 : i32
    %c0_i32_0 = arith.constant 0 : i32
    %c0_i32_1 = arith.constant 0 : i32
    return %c0_i32, %c0_i32_0 : i32, i32
  }
  func.func @transform_6(%arg0: i32) -> (i32, i32) {
    %c0_i32 = arith.constant 0 : i32
    %c0_i32_0 = arith.constant 0 : i32
    %c0_i32_1 = arith.constant 0 : i32
    return %c0_i32, %c0_i32_0 : i32, i32
  }
  func.func @transform_7(%arg0: i32) -> (i32, i32) {
    %c0_i32 = arith.constant 0 : i32
    %c0_i32_0 = arith.constant 0 : i32
    %c0_i32_1 = arith.constant 0 : i32
    return %c0_i32, %c0_i32_0 : i32, i32
  }
  func.func @transform_8(%arg0: i32) -> (i32, i32) {
    %c0_i32 = arith.constant 0 : i32
    %c0_i32_0 = arith.constant 0 : i32
    %c0_i32_1 = arith.constant 0 : i32
    return %c0_i32, %c0_i32_0 : i32, i32
  }
  func.func @transform_9(%arg0: i32) -> (i32, i32) {
    %c0_i32 = arith.constant 0 : i32
    %c0_i32_0 = arith.constant 0 : i32
    %c0_i32_1 = arith.constant 0 : i32
    return %c0_i32, %c0_i32_0 : i32, i32
  }
  func.func @transform_10(%arg0: i32) -> (i32, i32, i32) {
    %c0_i32 = arith.constant 0 : i32
    %c0_i32_0 = arith.constant 0 : i32
    %c0_i32_1 = arith.constant 0 : i32
    return %arg0, %c0_i32, %c0_i32_0 : i32, i32, i32
  }
}

</mosaic_0001>

<bundles_post_ra>
// kernel: tpu_custom_call.1
= control target key start
LH: loop header
LB: loop body
LE: loop exit
PB: predicated region body
PF: predicated region fallthrough
CT: control target
= control target key end

     0   :  { %v97_v1 = vlaneseq  ;;  %v1029_v2 = vmov 0.0   ;;  %vm1030_vm0 = vmmov 0   ;;  %vm52_vm1 = vcmask 130048   ;;  %s1347_s0 = inlined_call_operand.vmem [shape: bf16[1,16,128], index: 0, kind: input, shape index: {}]   ;;  %s1348_s1 = inlined_call_operand.vmem [shape: bf16[16,16], index: 1, kind: input, shape index: {}]   ;;  %s1349_s2 = inlined_call_operand.vmem [shape: f32[2,16], index: 2, kind: input, shape index: {}]   ;;  %s1350_s3 = inlined_call_operand.vmem [shape: f32[128,12], index: 3, kind: input, shape index: {}]   ;;  %s1351_s4 = inlined_call_operand.vmem [shape: f32[12,128], index: 4, kind: input, shape index: {}]   ;;  %s1352_s5 = inlined_call_operand.vmem [shape: f32[16,2], index: 5, kind: input, shape index: {}]   ;;  %s1353_s6 = inlined_call_operand.vmem [shape: f32[1,128], index: 6, kind: input, shape index: {}]   ;;  %s1354_s7 = inlined_call_operand.vmem [shape: f32[12,240], index: 7, kind: input, shape index: {}]   ;;  %s1355_s8 = inlined_call_operand.vmem [shape: f32[240,16], index: 8, kind: input, shape index: {}]   ;;  %s1356_s9 = inlined_call_operand.vmem [shape: f32[16,12], index: 9, kind: input, shape index: {}]   ;;  %s1357_s10 = inlined_call_operand.hbm [shape: f32[1,16,128], index: 10, kind: output, shape index: {}]  }
   0x1   :  { %v999_v0 = vld [vmem:[%s1347_s0] sm:$0xff]   ;;  %834 = vmatprep.subr.bf16.mxu0 %v1029_v2  ;;  %836 = vmatprep.mubr.msk.bf16.mxu0 %vm1030_vm0, %v1029_v2 }
   0x2   :  { %v1000_v3 = vld [vmem:[%s1348_s1] sm:$0xff]   ;;  %835 = vmatpush3.bf16.msra.mxu0 %v999_v0  ;;  %v98_v4 = vand.u32 127, %v97_v1 }
   0x3   :  { %15 = vsyncpa [#allocation3], 0  ;;  %s1031_s0 = smov 1   ;;  %s1032_s1 = smov 127   ;;  %v1033_v12 = vmov 0.0|0.0   ;;  %v152_v15 = vshrl.u32 %v97_v1, 7 }
   0x4   :  { %vm99_vm2 = vcmp.eq.s32.totalorder %v98_v4, 0  ;;  %901 = vmatprep.subr.bf16.mxu0 %v1033_v12  ;;  %934 = vmatprep.subr.bf16.mxu1 %v1033_v12  ;;  %v137_v17 = vld [vmem:[%s1353_s6] sm:$0x1]  ;;  %v244_v58 = vld [vmem:[%s1350_s3 + $0x8] sm:$0xff]  ;;  %v245_v62 = vld [vmem:[%s1350_s3 + $0x10] sm:$0xff]  ;;  %vm337_vm3 = vcmask 1043456  }
   0x5   :  { %837 = vmatmul.mubr.msk.bf16.vlgmr.msra.gmra.mrb[0].mxu0 %vm52_vm1, %v1000_v3  ;;  %v790_v5 = vsel %vm99_vm2, 1.0, %v1029_v2  ;;  %v153_v21 = vsub.s32 0, %v152_v15  ;;  %v158_v22 = vsub.f32 1.0, %v137_v17  ;;  %v243_v57 = vld [vmem:[%s1350_s3] sm:$0xff]  ;;  %v246_v63 = vld [vmem:[%s1350_s3 + $0x18] sm:$0xff]  ;;  %v248_v3 = vld [vmem:[%s1350_s3 + $0x28] sm:$0xff] }
   0x6   :  { %102 = vrot.lane.b32.xlu0 %v790_v5, %s1031_s0  ;;  %844 = vmatprep.mubr.msk.f32.mxu0 %vm1030_vm0, %v1029_v2  ;;  %v169_v60 = vld [vmem:[%s1349_s2] sm:$0x3]  ;;  %v905_v61 = vpack.c.bf16 %v244_v58, %v243_v57  ;;  %v908_v0 = vpack.c.bf16 %v246_v63, %v245_v62  ;;  %v249_v5 = vld [vmem:[%s1350_s3 + $0x30] sm:$0xff]  ;;  %vm1034_vm4 = vmmov 1   ;;  %v432_v57 = vld [vmem:[%s1355_s8 + $0x88] sm:$0xff]  ;;  %vm333_vm6 = vcmask 97280  }
   0x7   :  { %v154_v35 = vrot.slane %v137_v17, %v153_v21  ;;  %v163_v36 = vrot.slane %v158_v22, %v153_v21  ;;  %v247_v1 = vld [vmem:[%s1350_s3 + $0x20] sm:$0xff]  ;;  %v330_v21 = vld [vmem:[%s1354_s7 + $0x8] sm:$0xff]  ;;  %v332_v22 = vld [vmem:[%s1354_s7 + $0x18] sm:$0xf]  ;;  %vm445_vm7 = vcmask 916480   ;;  %vm681_vm8 = vcmask 15360  }
   0x8   :  { %v911_v4 = vpack.c.bf16 %v248_v3, %v247_v1  ;;  %v255_v15 = vld [vmem:[%s1350_s3 + $0x60] sm:$0xff]  ;;  %vm1185_vm5 = vmpackc.low %vm337_vm3, %vm1034_vm4  ;;  %v436_v63 = vld [vmem:[%s1355_s8 + $0xa8] sm:$0xff]  ;;  %vm688_vm9 = vcmask 1041408   ;;  %s1035_s29 = smov [#allocation2]  }
   0x9   :  { %v435_v62 = vld [vmem:[%s1355_s8 + $0xa0] sm:$0xff]  ;;  %v437_v1 = vld [vmem:[%s1355_s8 + $0xb0] sm:$0xff]  ;;  %v438_v3 = vld [vmem:[%s1355_s8 + $0xb8] sm:$0xff]  ;;  %s776_s2 = sshll.u32 %s1035_s29, 4  ;;  %s777_s2 = int_to_ptr.vmem [resolvable:$true] %s776_s2 }
   0xa   :  { %s1005_s30 = scalar_lea.vmem %s777_s2, 256  ;;  %p1010_p1 = scmp.lt.s32.totalorder %s777_s2, %s777_s2 }
   0xb   :  { %p1006_p0 = scmp.ne.s32.totalorder %s777_s2, %s1005_s30  ;;  %p1011_p2 = scmp.lt.s32.totalorder %s1005_s30, %s1005_s30 }
   0xd   :  { %p1012_p3 = por %p1011_p2, %p1010_p1 }
   0xf   :  { %p1013_p4 = pnand %p1012_p3, %p1006_p0 }
  0x78   :  { %v103_v6 = vpop.permute.xlu0 %102 }
  0x79   :  { %v120_v7 = vsub.f32 1.0, %v103_v6  ;;  %113 = vrot.lane.b32.xlu0 %v103_v6, %s1032_s1  ;;  %v250_v6 = vld [vmem:[%s1350_s3 + $0x38] sm:$0xff] }
  0x7b   :  { %122 = vrot.lane.b32.xlu1 %v120_v7, %s1032_s1  ;;  %v914_v7 = vpack.c.bf16 %v250_v6, %v249_v5  ;;  %v439_v5 = vld [vmem:[%s1355_s8 + $0xc0] sm:$0xff]  ;;  %v440_v6 = vld [vmem:[%s1355_s8 + $0xc8] sm:$0xff] }
  0xd8   :  { %v90_v8 = vpop.f32.mrb[0].mxu0 }
  0xd9   :  { %104 = vrot.lane.b32.xlu1 %v90_v8, %s1031_s0  ;;  %v838_v9 = vpop.f32.mrb[1].mxu0  ;;  %v138_v37 = vmul.f32 0.70710677, %v90_v8  ;;  %v146_v38 = vmul.f32 -0.70710677, %v90_v8 }
  0xda   :  { %v93_v10 = vpop.f32.mrb[2].mxu0  ;;  %v252_v9 = vld [vmem:[%s1350_s3 + $0x48] sm:$0xff] }
  0xdb   :  { %106 = vrot.lane.b32.xlu0 %v93_v10, %s1031_s0  ;;  %v839_v11 = vpop.f32.mrb[3].mxu0  ;;  %v139_v43 = vmul.f32 0.70710677, %v93_v10  ;;  %v147_v44 = vmul.f32 -0.70710677, %v93_v10 }
  0xdc   :  { %v253_v11 = vld [vmem:[%s1350_s3 + $0x50] sm:$0xff] }
  0xdd   :  { %108 = vrot.lane.b32.xlu1 %v90_v8, %s1032_s1  ;;  %v251_v8 = vld [vmem:[%s1350_s3 + $0x40] sm:$0xff] }
  0xdf   :  { %110 = vrot.lane.b32.xlu0 %v93_v10, %s1032_s1  ;;  %v917_v10 = vpack.c.bf16 %v252_v9, %v251_v8  ;;  %v441_v8 = vld [vmem:[%s1355_s8 + $0xd0] sm:$0xff]  ;;  %v442_v9 = vld [vmem:[%s1355_s8 + $0xd8] sm:$0xff] }
  0xeb   :  { %v114_v13 = vpop.permute.xlu0 %113 }
  0xec   :  { %986 = vpush %v114_v13  ;;  %v254_v13 = vld [vmem:[%s1350_s3 + $0x58] sm:$0xff] }
  0xed   :  { %v123_v14 = vpop.permute.xlu1 %122 }
  0xee   :  { %988 = vpush %v123_v14  ;;  %v920_v14 = vpack.c.bf16 %v254_v13, %v253_v11 }
 0x11d   :  { %s987_s17 = spop %986 }
 0x11e   :  { %v116_v18 = vstv %s987_s17 }
 0x11f   :  { %s989_s18 = spop %988 }
 0x120   :  { %v125_v19 = vstv %s989_s18 }
 0x14b   :  { %v105_v16 = vpop.permute.xlu1 %104 }
 0x14c   :  { %v127_v24 = vmul.f32 %v125_v19, %v105_v16  ;;  %v131_v25 = vmul.f32 %v116_v18, %v105_v16  ;;  %v256_v16 = vld [vmem:[%s1350_s3 + $0x68] sm:$0xff] }
 0x14d   :  { %v107_v20 = vpop.permute.xlu0 %106  ;;  %v923_v17 = vpack.c.bf16 %v256_v16, %v255_v15  ;;  %v444_v15 = vld [vmem:[%s1355_s8 + $0xe8] sm:$0xff] }
 0x14e   :  { %v128_v28 = vmul.f32 %v125_v19, %v107_v20  ;;  %v132_v29 = vmul.f32 %v116_v18, %v107_v20 }
 0x14f   :  { %v109_v23 = vpop.permute.xlu1 %108 }
 0x150   :  { %v118_v26 = vmul.f32 %v116_v18, %v109_v23  ;;  %v133_v27 = vmul.f32 %v125_v19, %v109_v23  ;;  %v928_v23 = vpack.c.bf16 %v332_v22, %v330_v21 }
 0x151   :  { %v111_v30 = vpop.permute.xlu0 %110 }
 0x152   :  { %v129_v31 = vadd.f32 %v127_v24, %v118_v26  ;;  %v135_v32 = vadd.f32 %v133_v27, %v131_v25  ;;  %v119_v33 = vmul.f32 %v116_v18, %v111_v30  ;;  %v134_v34 = vmul.f32 %v125_v19, %v111_v30  ;;  %v257_v18 = vld [vmem:[%s1350_s3 + $0x70] sm:$0xff]  ;;  %v258_v19 = vld [vmem:[%s1350_s3 + $0x78] sm:$0xff]  ;;  %v329_v25 = vld [vmem:[%s1354_s7] sm:$0xff] }
 0x153   :  { %v926_v20 = vpack.c.bf16 %v258_v19, %v257_v18  ;;  %v331_v26 = vld [vmem:[%s1354_s7 + $0x10] sm:$0xf]  ;;  %v415_v30 = vld [vmem:[%s1355_s8] sm:$0xff]  ;;  %v680_v24 = vld [vmem:[%s1352_s5 + $0x8] sm:$0xff] }
 0x154   :  { %v140_v39 = vmul.f32 0.70710677, %v129_v31  ;;  %v144_v40 = vmul.f32 0.70710677, %v135_v32  ;;  %v130_v41 = vadd.f32 %v128_v28, %v119_v33  ;;  %v136_v42 = vadd.f32 %v134_v34, %v132_v29  ;;  %v416_v31 = vld [vmem:[%s1355_s8 + $0x8] sm:$0xff]  ;;  %v417_v32 = vld [vmem:[%s1355_s8 + $0x10] sm:$0xff] }
 0x155   :  { %v931_v27 = vpack.c.bf16 %v331_v26, %v329_v25  ;;  %v935_v33 = vpack.c.bf16 %v416_v31, %v415_v30  ;;  %v418_v34 = vld [vmem:[%s1355_s8 + $0x18] sm:$0xff]  ;;  %v520_v19 = vld [vmem:[%s1356_s9] sm:$0xff] }
 0x156   :  { %v142_v45 = vadd.f32 %v140_v39, %v138_v37  ;;  %v148_v46 = vadd.f32 %v146_v38, %v144_v40  ;;  %v141_v47 = vmul.f32 0.70710677, %v130_v41  ;;  %v145_v48 = vmul.f32 0.70710677, %v136_v42  ;;  %v420_v37 = vld [vmem:[%s1355_s8 + $0x28] sm:$0xff]  ;;  %v421_v39 = vld [vmem:[%s1355_s8 + $0x30] sm:$0xff] }
 0x157   :  { %936 = vmatpush1.bf16.msra.mxu1 %v935_v33  ;;  %v422_v40 = vld [vmem:[%s1355_s8 + $0x38] sm:$0xff]  ;;  %v423_v42 = vld [vmem:[%s1355_s8 + $0x40] sm:$0xff] }
 0x158   :  { %v156_v49 = vmul.f32 %v154_v35, %v142_v45  ;;  %v165_v50 = vmul.f32 %v163_v36, %v148_v46  ;;  %v143_v51 = vadd.f32 %v141_v47, %v139_v43  ;;  %v149_v52 = vadd.f32 %v147_v44, %v145_v48  ;;  %937 = vmatprep.subr.bf16.mxu1 %v1033_v12  ;;  %v424_v43 = vld [vmem:[%s1355_s8 + $0x48] sm:$0xff]  ;;  %v425_v45 = vld [vmem:[%s1355_s8 + $0x50] sm:$0xff]  ;;  %v426_v46 = vld [vmem:[%s1355_s8 + $0x58] sm:$0xff] }
 0x159   :  { %v944_v41 = vpack.c.bf16 %v422_v40, %v421_v39  ;;  %v947_v44 = vpack.c.bf16 %v424_v43, %v423_v42  ;;  %v950_v47 = vpack.c.bf16 %v426_v46, %v425_v45  ;;  %v427_v48 = vld [vmem:[%s1355_s8 + $0x60] sm:$0xff] }
 0x15a   :  { %v1111_v53 = vadd.f32 %v165_v50, %v156_v49  ;;  %v157_v54 = vmul.f32 %v154_v35, %v143_v51  ;;  %v166_v55 = vmul.f32 %v163_v36, %v149_v52  ;;  %v938_v35 = vpack.c.bf16 %v418_v34, %v417_v32  ;;  %v419_v36 = vld [vmem:[%s1355_s8 + $0x20] sm:$0xff]  ;;  %v428_v49 = vld [vmem:[%s1355_s8 + $0x68] sm:$0xff]  ;;  %v429_v51 = vld [vmem:[%s1355_s8 + $0x70] sm:$0xff] }
 0x15b   :  { %v941_v38 = vpack.c.bf16 %v420_v37, %v419_v36  ;;  %v953_v50 = vpack.c.bf16 %v428_v49, %v427_v48  ;;  %v430_v52 = vld [vmem:[%s1355_s8 + $0x78] sm:$0xff]  ;;  %v601_v26 = vld [vmem:[%s1351_s4] sm:$0xff] }
 0x15c   :  { %v1113_v56 = vadd.f32 %v166_v55, %v157_v54  ;;  %939 = vmatpush1.bf16.msra.mxu1 %v938_v35  ;;  %v956_v54 = vpack.c.bf16 %v430_v52, %v429_v51  ;;  %v431_v55 = vld [vmem:[%s1355_s8 + $0x80] sm:$0xff] }
 0x15d   :  { %940 = vmatprep.subr.bf16.mxu1 %v1033_v12  ;;  %v959_v58 = vpack.c.bf16 %v432_v57, %v431_v55  ;;  %v679_v33 = vld [vmem:[%s1352_s5] sm:$0xff] }
 0x15e   :  { %v902_v59 = vpack.c.bf16 %v1113_v56, %v1111_v53 }
 0x160   :  { %903 = vmatpush3.bf16.msra.mxu0 %v902_v59  ;;  %942 = vmatpush1.bf16.msra.mxu1 %v941_v38  ;;  %v433_v59 = vld [vmem:[%s1355_s8 + $0x90] sm:$0xff] }
 0x161   :  { %904 = vmatprep.subr.bf16.mxu0 %v1033_v12  ;;  %943 = vmatprep.subr.bf16.mxu1 %v1033_v12 }
 0x163   :  { %845 = vmatmul.mubr.msk.f32.vlgmr.msra.gmra.mrb[4].mxu0 %vm52_vm1, %v169_v60  ;;  %v434_v60 = vld [vmem:[%s1355_s8 + $0x98] sm:$0xff] }
 0x164   :  { %906 = vmatpush3.bf16.msra.mxu0 %v905_v61  ;;  %879 = vmatprep.mubr.msk.f32.mxu0 %vm1030_vm0, %v1029_v2  ;;  %v962_v61 = vpack.c.bf16 %v434_v60, %v433_v59 }
 0x165   :  { %907 = vmatprep.subr.bf16.mxu0 %v1033_v12  ;;  %945 = vmatpush1.bf16.msra.mxu1 %v944_v41 }
 0x166   :  { %946 = vmatprep.subr.bf16.mxu1 %v1033_v12 }
 0x168   :  { %909 = vmatpush3.bf16.msra.mxu0 %v908_v0  ;;  %v965_v0 = vpack.c.bf16 %v436_v63, %v435_v62 }
 0x169   :  { %910 = vmatprep.subr.bf16.mxu0 %v1033_v12  ;;  %948 = vmatpush1.bf16.msra.mxu1 %v947_v44 }
 0x16a   :  { %949 = vmatprep.subr.bf16.mxu1 %v1033_v12 }
 0x16c   :  { %912 = vmatpush3.bf16.msra.mxu0 %v911_v4  ;;  %v968_v4 = vpack.c.bf16 %v438_v3, %v437_v1 }
 0x16d   :  { %913 = vmatprep.subr.bf16.mxu0 %v1033_v12  ;;  %951 = vmatpush1.bf16.msra.mxu1 %v950_v47 }
 0x16e   :  { %952 = vmatprep.subr.bf16.mxu1 %v1033_v12 }
 0x170   :  { %915 = vmatpush3.bf16.msra.mxu0 %v914_v7  ;;  %v971_v7 = vpack.c.bf16 %v440_v6, %v439_v5 }
 0x171   :  { %916 = vmatprep.subr.bf16.mxu0 %v1033_v12  ;;  %954 = vmatpush1.bf16.msra.mxu1 %v953_v50 }
 0x172   :  { %955 = vmatprep.subr.bf16.mxu1 %v1033_v12 }
 0x174   :  { %918 = vmatpush3.bf16.msra.mxu0 %v917_v10  ;;  %v974_v10 = vpack.c.bf16 %v442_v9, %v441_v8 }
 0x175   :  { %919 = vmatprep.subr.bf16.mxu0 %v1033_v12  ;;  %957 = vmatpush1.bf16.msra.mxu1 %v956_v54 }
 0x176   :  { %958 = vmatprep.subr.bf16.mxu1 %v1033_v12 }
 0x178   :  { %921 = vmatpush3.bf16.msra.mxu0 %v920_v14  ;;  %v443_v14 = vld [vmem:[%s1355_s8 + $0xe0] sm:$0xff] }
 0x179   :  { %922 = vmatprep.subr.bf16.mxu0 %v1033_v12  ;;  %960 = vmatpush1.bf16.msra.mxu1 %v959_v58  ;;  %v977_v16 = vpack.c.bf16 %v444_v15, %v443_v14 }
 0x17a   :  { %961 = vmatprep.subr.bf16.mxu1 %v1033_v12 }
 0x17c   :  { %924 = vmatpush3.bf16.msra.mxu0 %v923_v17 }
 0x17d   :  { %925 = vmatprep.subr.bf16.mxu0 %v1033_v12  ;;  %963 = vmatpush1.bf16.msra.mxu1 %v962_v61 }
 0x17e   :  { %964 = vmatprep.subr.bf16.mxu1 %v1033_v12 }
 0x180   :  { %927 = vmatpush3.bf16.msra.mxu0 %v926_v20  ;;  %v521_v20 = vld [vmem:[%s1356_s9 + $0x8] sm:$0xff] }
 0x181   :  { %930 = vmatprep.subr.msk.bf16.mxu0 %vm1185_vm5, %v928_v23  ;;  %966 = vmatpush1.bf16.msra.mxu1 %v965_v0  ;;  %v980_v21 = vpack.c.bf16 %v521_v20, %v520_v19 }
 0x182   :  { %967 = vmatprep.subr.bf16.mxu1 %v1033_v12 }
 0x185   :  { %969 = vmatpush1.bf16.msra.mxu1 %v968_v4 }
 0x186   :  { %970 = vmatprep.subr.bf16.mxu1 %v1033_v12 }
 0x189   :  { %972 = vmatpush1.bf16.msra.mxu1 %v971_v7 }
 0x18a   :  { %973 = vmatprep.subr.bf16.mxu1 %v1033_v12 }
 0x18d   :  { %975 = vmatpush1.bf16.msra.mxu1 %v974_v10 }
 0x18e   :  { %976 = vmatprep.subr.bf16.mxu1 %v1033_v12 }
 0x191   :  { %978 = vmatpush1.bf16.msra.mxu1 %v977_v16 }
 0x236   :  { %v239_v28 = vpop.f32.mrb[4].mxu0 }
 0x237   :  { %880 = vmatmul.mubr.f32.vlgmr.msra.gmra.mrb[6].mxu0 %v239_v28  ;;  %v846_v29 = vpop.f32.mrb[5].mxu0 }
 0x238   :  { %933 = vmatpush1.bf16.msk.msra.mxu0 %vm1185_vm5, %v931_v27  ;;  %408 = vmatprep.mubr.f32.mxu0 %v1029_v2  ;;  %v602_v27 = vld [vmem:[%s1351_s4 + $0x8] sm:$0xf] }
 0x239   :  { %979 = vmatprep.subr.bf16.mxu0 %v1033_v12  ;;  %v983_v28 = vpack.c.bf16 %v602_v27, %v601_v26 }
 0x30a   :  { %v325_v11 = vpop.f32.mrb[6].mxu0 }
 0x30b   :  { %794 = vmatmul.mubr.msk.f32.vlgmr.msra.gmra.mrb[8].mxu0 %vm333_vm6, %v325_v11  ;;  %v881_v13 = vpop.f32.mrb[7].mxu0 }
 0x30c   :  { %886 = vmatprep.mubr.msk.f32.mxu0 %vm1030_vm0, %v1029_v2  ;;  %981 = vmatpush3.bf16.msra.mxu0 %v980_v21 }
 0x30d   :  { %982 = vmatprep.subr.bf16.mxu0 %v1033_v12 }
 0x3de   :  { %v410_v17 = vpop.f32.mrb[8].mxu0 }
 0x3df   :  { %v412_v18 = vpop.f32.mrb[9].mxu0 }
 0x3e0   :  { %795 = vmatprep.mubr.msk.f32.mxu1 %vm445_vm7, %v412_v18 }
 0x3e1   :  { %514 = vmatmul.mubr.f32.vlgmr.msra.gmra.mrb[0].mxu1 %v410_v17 }
 0x4b4   :  { %v515_v22 = vpop.f32.mrb[0].mxu1 }
 0x4b5   :  { %v519_v23 = vmax.f32 %v515_v22, 0.0  ;;  %v517_v25 = vpop.f32.mrb[1].mxu1 }
 0x4b7   :  { %887 = vmatmul.mubr.msk.f32.vlgmr.msra.gmra.mrb[10].mxu0 %vm52_vm1, %v519_v23 }
 0x4b8   :  { %893 = vmatprep.mubr.msk.f32.mxu0 %vm1030_vm0, %v1029_v2  ;;  %985 = vmatpush3.bf16.msk.msra.mxu0 %vm1185_vm5, %v983_v28 }
 0x58a   :  { %v591_v12 = vpop.f32.mrb[10].mxu0 }
 0x58b   :  { %v797_v29 = vmul.f32 -1.442695, %v591_v12  ;;  %v888_v30 = vpop.f32.mrb[11].mxu0 }
 0x58d   :  { %1001 = vpow2.f32 %v797_v29 }
 0x597   :  { %v1002_v31 = vpop.eup %1001 }
 0x598   :  { %v598_v32 = vadd.f32 1.0, %v1002_v31 }
 0x59a   :  { %1003 = vrcp.f32 %v598_v32 }
 0x5a4   :  { %v1004_v2 = vpop.eup %1003 }
 0x5a5   :  { %894 = vmatmul.mubr.msk.f32.vlgmr.msra.gmra.mrb[12].mxu0 %vm333_vm6, %v1004_v2 }
 0x5a6   :  { %898 = vmatprep.mubr.msk.f32.mxu0 %vm681_vm8, %v679_v33 }
 0x678   :  { %v675_v34 = vpop.f32.mrb[12].mxu0 }
 0x679   :  { %v895_v35 = vpop.f32.mrb[13].mxu0  ;;  %896 = vmatprep.subr.msk.mxu0 %vm688_vm9, %v675_v34 }
 0x67a   :  { %897 = vmatpush3.msk.msra.mxu0 %vm688_vm9, %v675_v34 }
 0x67b   :  { %899 = vmatmul.mubr.msk.f32.vlgmr.msra.gmra.mrb[14].mxu0 %vm681_vm8, %v680_v24 }
 0x74e   :  { %v900_v36 = vpop.f32.mrb[14].mxu0 }
 0x74f   :  { %v768_v37 = vmul.f32 %v900_v36, %v1113_v56  ;;  %v758_v38 = vpop.f32.mrb[15].mxu0 }
 0x750   :  { %v767_v39 = vmul.f32 %v758_v38, %v1111_v53 }
 0x751   :  { %770 = vst [vmem:[#allocation2 + $0x8] sm:$0xff] %v768_v37 }
 0x752   :  { %769 = vst [vmem:[#allocation2] sm:$0xff] %v767_v39 }
 0x753   :  { %1016 = shalt.err (!%p1013_p4)
}
 0x754   :  { %s1017_s12 = scalar_lea.hbm %s1357_s10, 256 }
 0x755   :  { %p1018_p5 = scmp.ne.s32.totalorder %s1357_s10, %s1017_s12  ;;  %p1021_p6 = scmp.lt.u32.totalorder %s1017_s12, %s1357_s10 }
 0x757   :  { %p1023_p7 = pnand %p1021_p6, %p1018_p5 }
 0x759   :  { %1026 = shalt.err (!%p1023_p7)
}
 0x75a   :  { %s1036_s16 = smov 128   ;;  %s1037_s0 = smov 8  }
 0x75b   :  { %782 = dma.vmem_to_hbm [thread:$0]  %s777_s2, 256, %s1357_s10, [#allocation3], %s1036_s16, %s1036_s16, %s1037_s0  }
 0x75c   :  { %1027 = dma.done.wait [#allocation3], 256  }
 0x75d   :  { %1028 = vsyncadd [#allocation3], 4294967040 }
 0x75e   :  { %786 = vsyncpa [#allocation3], 1 }

</bundles_post_ra>
